<compile_context>
chip_gen: v7x
topology: tpu7x:2x2x1
jax: 0.10.0
libtpu: 0.0.40
codegen_flags: <defaults>
</compile_context>

<pallas_src>
import jax
import jax.numpy as jnp
from jax.experimental import pallas as pl
from jax.experimental.pallas import tpu as pltpu


def _round_up(x, m):
    return ((x + m - 1) // m) * m


def _batch_tile(batch):
    """Sublane-aligned batch tile; >=2 grid steps when batch allows, cap 2048."""
    if batch <= 8:
        return batch                      # block == full dim -> always legal
    bp8 = _round_up(batch, 8)
    half = _round_up(pl.cdiv(bp8, 2), 8)  # at least 2 steps (v7x 2-TC sharding)
    return min(2048, half)


# ------------------------------- kernels -----------------------------------


def _lti_step_w_kernel(x_ref, u_ref, w_ref, at_ref, bt_ref, o_ref):
    """o = x @ A^T + u @ B^T + w : two MXU dots into one f32 acc + VPU add."""
    acc = jnp.dot(x_ref[...], at_ref[...], preferred_element_type=jnp.float32)
    acc = acc + jnp.dot(u_ref[...], bt_ref[...], preferred_element_type=jnp.float32)
    o_ref[...] = (acc + w_ref[...]).astype(o_ref.dtype)


def _lti_step_kernel(x_ref, u_ref, at_ref, bt_ref, o_ref):
    """Noiseless variant: o = x @ A^T + u @ B^T (no w input at all)."""
    acc = jnp.dot(x_ref[...], at_ref[...], preferred_element_type=jnp.float32)
    acc = acc + jnp.dot(u_ref[...], bt_ref[...], preferred_element_type=jnp.float32)
    o_ref[...] = acc.astype(o_ref.dtype)


def _lti_rollout_kernel(x0_ref, u0_ref, w_ref, at_ref, bt_ref, kt_ref,
                        xlog_ref, ulog_ref, x_sc, u_sc):
    """One closed-loop step per (batch_tile, t) grid point; state in VMEM."""
    t = pl.program_id(1)

    @pl.when(t == 0)
    def _():
        x_sc[...] = jnp.broadcast_to(x0_ref[...], x_sc.shape)
        u_sc[...] = jnp.broadcast_to(u0_ref[...], u_sc.shape)

    x_new = (jnp.dot(x_sc[...], at_ref[...], preferred_element_type=jnp.float32)
             + jnp.dot(u_sc[...], bt_ref[...], preferred_element_type=jnp.float32)
             + w_ref[0])
    u_new = jnp.dot(x_new, kt_ref[...], preferred_element_type=jnp.float32)
    x_sc[...] = x_new
    u_sc[...] = u_new
    xlog_ref[0] = x_new
    ulog_ref[0] = u_new


# ---------------------------- pallas wrappers --------------------------------


@jax.jit
def _lti_forward_batched(x2d, u2d, w2d, At, Bt):
    batch, s = x2d.shape
    i = u2d.shape[1]
    tb = _batch_tile(batch)
    grid = (pl.cdiv(batch, tb),)

    def row_spec(shape):
        return pl.BlockSpec(shape, lambda b: (b, 0))

    def const_spec(shape):
        return pl.BlockSpec(shape, lambda b: (0, 0))   # weight stays VMEM-resident

    return pl.pallas_call(
        _lti_step_w_kernel,
        out_shape=jax.ShapeDtypeStruct((batch, s), jnp.float32),
        grid=grid,
        in_specs=[row_spec((tb, s)), row_spec((tb, i)), row_spec((tb, s)),
                  const_spec((s, s)), const_spec((i, s))],
        out_specs=row_spec((tb, s)),
        compiler_params=pltpu.CompilerParams(dimension_semantics=("parallel",)),
        cost_estimate=pl.CostEstimate(
            flops=2 * batch * s * s + 2 * batch * i * s + batch * s,
            transcendentals=0,
            bytes_accessed=4 * (batch * (3 * s + i) + s * s + i * s)),
    )(x2d, u2d, w2d, At, Bt)


@jax.jit
def _lti_noiseless_batched(x2d, u2d, At, Bt):
    batch, s = x2d.shape
    i = u2d.shape[1]
    tb = _batch_tile(batch)
    grid = (pl.cdiv(batch, tb),)

    def row_spec(shape):
        return pl.BlockSpec(shape, lambda b: (b, 0))

    def const_spec(shape):
        return pl.BlockSpec(shape, lambda b: (0, 0))

    return pl.pallas_call(
        _lti_step_kernel,
        out_shape=jax.ShapeDtypeStruct((batch, s), jnp.float32),
        grid=grid,
        in_specs=[row_spec((tb, s)), row_spec((tb, i)),
                  const_spec((s, s)), const_spec((i, s))],
        out_specs=row_spec((tb, s)),
        compiler_params=pltpu.CompilerParams(dimension_semantics=("parallel",)),
        cost_estimate=pl.CostEstimate(
            flops=2 * batch * s * s + 2 * batch * i * s,
            transcendentals=0,
            bytes_accessed=4 * (batch * (2 * s + i) + s * s + i * s)),
    )(x2d, u2d, At, Bt)


@jax.jit
def _lti_rollout_linear(x0, u0, wT, At, Bt, Kt):
    """Whole closed-loop rollout in ONE pallas_call; wT is time-major (T,B,S)."""
    T, batch, s = wT.shape
    i = Bt.shape[0]
    tb = _batch_tile(batch)
    grid = (pl.cdiv(batch, tb), T)

    return pl.pallas_call(
        _lti_rollout_kernel,
        out_shape=(jax.ShapeDtypeStruct((T, batch, s), jnp.float32),
                   jax.ShapeDtypeStruct((T, batch, i), jnp.float32)),
        grid=grid,
        in_specs=[
            pl.BlockSpec((1, s), lambda b, t: (0, 0)),          # x_init
            pl.BlockSpec((1, i), lambda b, t: (0, 0)),          # u_init
            pl.BlockSpec((1, tb, s), lambda b, t: (t, b, 0)),   # w_t
            pl.BlockSpec((s, s), lambda b, t: (0, 0)),          # A^T (resident)
            pl.BlockSpec((i, s), lambda b, t: (0, 0)),          # B^T (resident)
            pl.BlockSpec((s, i), lambda b, t: (0, 0)),          # K^T (resident)
        ],
        out_specs=(
            pl.BlockSpec((1, tb, s), lambda b, t: (t, b, 0)),   # x_log
            pl.BlockSpec((1, tb, i), lambda b, t: (t, b, 0)),   # u_log
        ),
        scratch_shapes=[pltpu.VMEM((tb, s), jnp.float32),
                        pltpu.VMEM((tb, i), jnp.float32)],
        compiler_params=pltpu.CompilerParams(
            dimension_semantics=("parallel", "arbitrary")),
        cost_estimate=pl.CostEstimate(
            flops=T * (2 * batch * s * s + 2 * batch * i * s + 2 * batch * s * i),
            transcendentals=0,
            bytes_accessed=4 * (T * batch * (2 * s + i) + s * s + 2 * i * s)),
    )(x0, u0, wT, At, Bt, Kt)


# ------------------------------- module ------------------------------------


class LTISystem:
    """JAX/Pallas port of the PyTorch LTISystem (buffers A, B, C, x_init, u_init)."""

    def __init__(self, A, B, C, x_init, u_init=None):
        self.A = jnp.asarray(A, dtype=jnp.float32)
        self.B = jnp.asarray(B, dtype=jnp.float32)
        self.C = jnp.asarray(C, dtype=jnp.float32)
        self.state_dim = self.A.shape[0]
        self.in_dim = self.B.shape[1]
        self.out_dim = self.C.shape[0]
        assert self.A.shape == (self.state_dim, self.state_dim)
        assert self.B.shape == (self.state_dim, self.in_dim)
        assert self.C.shape == (self.out_dim, self.state_dim)
        self.x_init = jnp.asarray(x_init, dtype=jnp.float32).reshape(1, self.state_dim)
        if u_init is None:
            self.u_init = jnp.zeros((1, self.in_dim), dtype=jnp.float32)
        else:
            self.u_init = jnp.asarray(u_init, dtype=jnp.float32).reshape(1, self.in_dim)
        # Transposed weights built once (row-vector convention: y = x @ A^T + u @ B^T).
        self._At = self.A.T          # (S, S)
        self._Bt = self.B.T          # (I, S)

    def noiseless_forward(self, t, x, u):
        x2d = jnp.reshape(x, (-1, self.state_dim)).astype(jnp.float32)
        u2d = jnp.reshape(u, (-1, self.in_dim)).astype(jnp.float32)
        f = _lti_noiseless_batched(x2d, u2d, self._At, self._Bt)
        return f.reshape(-1, 1, self.state_dim)

    def forward(self, t, x, u, w):
        x2d = jnp.reshape(x, (-1, self.state_dim)).astype(jnp.float32)
        u2d = jnp.reshape(u, (-1, self.in_dim)).astype(jnp.float32)
        w2d = jnp.reshape(w, (-1, self.state_dim)).astype(jnp.float32)
        f = _lti_forward_batched(x2d, u2d, w2d, self._At, self._Bt)
        return f.reshape(-1, 1, self.state_dim)

    def rollout_linear(self, K, data):
        """Closed-loop rollout with a static linear gain controller u = K x,
        fused into a single pallas_call (time grid axis, state in VMEM scratch)."""
        data = jnp.asarray(data, dtype=jnp.float32)
        batch, T, _ = data.shape
        Kt = jnp.asarray(K, dtype=jnp.float32).T            # (S, I)
        wT = jnp.swapaxes(data, 0, 1)                       # (T, B, S) time-major
        xlog_T, ulog_T = _lti_rollout_linear(self.x_init, self.u_init, wT,
                                             self._At, self._Bt, Kt)
        return jnp.swapaxes(xlog_T, 0, 1), None, jnp.swapaxes(ulog_T, 0, 1)

    def rollout(self, controller, data):
        # TODO(synk): an arbitrary stateful Python `controller` cannot be fused
        # in-kernel; this generic path loops on the host over the fused forward
        # kernel (use rollout_linear for the single-pallas_call fused version).
        data = jnp.asarray(data, dtype=jnp.float32)
        batch = data.shape[0]
        controller.reset()
        x = jnp.tile(self.x_init[None], (batch, 1, 1))
        u = jnp.tile(self.u_init[None], (batch, 1, 1))
        xs, us = [], []
        for t in range(data.shape[1]):
            x = self.forward(t=t, x=x, u=u, w=data[:, t:t + 1, :])
            u = controller(x)
            xs.append(x)
            us.append(u)
        controller.reset()
        return jnp.concatenate(xs, axis=1), None, jnp.concatenate(us, axis=1)


if __name__ == "__main__":
    key = jax.random.PRNGKey(0)
    kA, kB, kC, kx0, kx, ku, kw, kK, kd, kx2, ku2, kw2 = jax.random.split(key, 12)

    batch, state_dim, in_dim, out_dim, T = 4, 32, 8, 16, 6

    A = 0.1 * jax.random.normal(kA, (state_dim, state_dim), dtype=jnp.float32)
    Bm = 0.1 * jax.random.normal(kB, (state_dim, in_dim), dtype=jnp.float32)
    Cm = 0.1 * jax.random.normal(kC, (out_dim, state_dim), dtype=jnp.float32)
    x_init = jax.random.normal(kx0, (state_dim,), dtype=jnp.float32)

    sys = LTISystem(A, Bm, Cm, x_init)

    # --- forward / noiseless_forward, small batch (grid=(1,), full-dim block) ---
    x = jax.random.normal(kx, (batch, 1, state_dim), dtype=jnp.float32)
    u = jax.random.normal(ku, (batch, 1, in_dim), dtype=jnp.float32)
    w = jax.random.normal(kw, (batch, 1, state_dim), dtype=jnp.float32)

    out = jax.block_until_ready(sys.forward(t=0, x=x, u=u, w=w))
    out_nl = jax.block_until_ready(sys.noiseless_forward(t=0, x=x, u=u))

    ref_nl = (jnp.einsum("ij,bj->bi", A, x[:, 0, :])
              + jnp.einsum("ij,bj->bi", Bm, u[:, 0, :])).reshape(batch, 1, state_dim)
    ref = ref_nl + w

    assert out.shape == (batch, 1, state_dim) and out.dtype == jnp.float32
    assert out_nl.shape == (batch, 1, state_dim)
    assert jnp.allclose(out, ref, atol=1e-5, rtol=1e-5)
    assert jnp.allclose(out_nl, ref_nl, atol=1e-5, rtol=1e-5)

    # --- forward, non-tile-aligned batch (exercises multi-step grid + ragged block) ---
    batch2 = 20
    x2 = jax.random.normal(kx2, (batch2, 1, state_dim), dtype=jnp.float32)
    u2 = jax.random.normal(ku2, (batch2, 1, in_dim), dtype=jnp.float32)
    w2 = jax.random.normal(kw2, (batch2, 1, state_dim), dtype=jnp.float32)
    out2 = jax.block_until_ready(sys.forward(t=0, x=x2, u=u2, w=w2))
    ref2 = (jnp.einsum("ij,bj->bi", A, x2[:, 0, :])
            + jnp.einsum("ij,bj->bi", Bm, u2[:, 0, :])).reshape(batch2, 1, state_dim) + w2
    assert jnp.allclose(out2, ref2, atol=1e-5, rtol=1e-5)

    # --- fused closed-loop rollout with static linear gain u = K x ---
    K = 0.05 * jax.random.normal(kK, (in_dim, state_dim), dtype=jnp.float32)
    data = 0.1 * jax.random.normal(kd, (batch, T, state_dim), dtype=jnp.float32)
    x_log, _, u_log = sys.rollout_linear(K, data)
    x_log, u_log = jax.block_until_ready((x_log, u_log))

    xr = jnp.tile(x_init.reshape(1, state_dim), (batch, 1))
    ur = jnp.zeros((batch, in_dim), dtype=jnp.float32)
    xs, us = [], []
    for t in range(T):
        xr = xr @ A.T + ur @ Bm.T + data[:, t, :]
        ur = xr @ K.T
        xs.append(xr)
        us.append(ur)
    ref_x = jnp.stack(xs, axis=1)
    ref_u = jnp.stack(us, axis=1)

    assert x_log.shape == (batch, T, state_dim)
    assert u_log.shape == (batch, T, in_dim)
    assert jnp.allclose(x_log, ref_x, atol=1e-4, rtol=1e-4)
    assert jnp.allclose(u_log, ref_u, atol=1e-4, rtol=1e-4)

    print("KERNEL_OK")
</pallas_src>

<mosaic_0001>
module attributes {stable_mosaic.version = 11 : i64} {
  func.func @_lti_step_w_kernel(%arg0: i32, %arg1: memref<4x32xf32, #tpu.memory_space<vmem>>, %arg2: memref<4x8xf32, #tpu.memory_space<vmem>>, %arg3: memref<4x32xf32, #tpu.memory_space<vmem>>, %arg4: memref<32x32xf32, #tpu.memory_space<vmem>>, %arg5: memref<8x32xf32, #tpu.memory_space<vmem>>, %arg6: memref<4x32xf32, #tpu.memory_space<vmem>>) attributes {dimension_semantics = [#tpu.dimension_semantics<parallel>], iteration_bounds = array<i64: 1>, scalar_prefetch = 0 : i64, scratch_operands = 0 : i64, tpu.core_type = #tpu.core_type<tc>, window_params = [{transform_indices = @transform_0, window_bounds = array<i64: 4, 32>}, {transform_indices = @transform_1, window_bounds = array<i64: 4, 8>}, {transform_indices = @transform_2, window_bounds = array<i64: 4, 32>}, {pipeline_mode = #tpu.pipeline_mode<synchronous>, transform_indices = @transform_3, window_bounds = array<i64: 32, 32>}, {pipeline_mode = #tpu.pipeline_mode<synchronous>, transform_indices = @transform_4, window_bounds = array<i64: 8, 32>}, {transform_indices = @transform_5, window_bounds = array<i64: 4, 32>}]} {
    %c0 = arith.constant 0 : index
    %c0_0 = arith.constant 0 : index
    %0 = vector.load %arg1[%c0, %c0_0] : memref<4x32xf32, #tpu.memory_space<vmem>>, vector<4x32xf32>
    %c0_1 = arith.constant 0 : index
    %c0_2 = arith.constant 0 : index
    %1 = vector.load %arg4[%c0_1, %c0_2] : memref<32x32xf32, #tpu.memory_space<vmem>>, vector<32x32xf32>
    %cst = arith.constant dense<0.000000e+00> : vector<4x32xf32>
    %2 = tpu.matmul %0, %1, %cst {dimension_numbers = #tpu.dot_dimension_numbers<[1], [0], [0], [1], [0, 0, 1, 1], [], []>} : vector<4x32xf32>, vector<32x32xf32>, vector<4x32xf32> -> vector<4x32xf32>
    %c0_3 = arith.constant 0 : index
    %c0_4 = arith.constant 0 : index
    %3 = vector.load %arg2[%c0_3, %c0_4] : memref<4x8xf32, #tpu.memory_space<vmem>>, vector<4x8xf32>
    %c0_5 = arith.constant 0 : index
    %c0_6 = arith.constant 0 : index
    %4 = vector.load %arg5[%c0_5, %c0_6] : memref<8x32xf32, #tpu.memory_space<vmem>>, vector<8x32xf32>
    %cst_7 = arith.constant dense<0.000000e+00> : vector<4x32xf32>
    %5 = tpu.matmul %3, %4, %cst_7 {dimension_numbers = #tpu.dot_dimension_numbers<[1], [0], [0], [1], [0, 0, 1, 1], [], []>} : vector<4x8xf32>, vector<8x32xf32>, vector<4x32xf32> -> vector<4x32xf32>
    %6 = arith.addf %2, %5 : vector<4x32xf32>
    %c0_8 = arith.constant 0 : index
    %c0_9 = arith.constant 0 : index
    %7 = vector.load %arg3[%c0_8, %c0_9] : memref<4x32xf32, #tpu.memory_space<vmem>>, vector<4x32xf32>
    %8 = arith.addf %6, %7 : vector<4x32xf32>
    %c0_10 = arith.constant 0 : index
    %c0_11 = arith.constant 0 : index
    %9 = vector.load %arg6[%c0_10, %c0_11] : memref<4x32xf32, #tpu.memory_space<vmem>>, vector<4x32xf32>
    tpu.vector_store %arg6[%c0_10, %c0_11], %8 {strides = array<i32>} : memref<4x32xf32, #tpu.memory_space<vmem>>, vector<4x32xf32>,
    return
  }
  func.func @transform_0(%arg0: i32) -> (i32, i32) {
    %c0_i32 = arith.constant 0 : i32
    %c0_i32_0 = arith.constant 0 : i32
    return %arg0, %c0_i32 : i32, i32
  }
  func.func @transform_1(%arg0: i32) -> (i32, i32) {
    %c0_i32 = arith.constant 0 : i32
    %c0_i32_0 = arith.constant 0 : i32
    return %arg0, %c0_i32 : i32, i32
  }
  func.func @transform_2(%arg0: i32) -> (i32, i32) {
    %c0_i32 = arith.constant 0 : i32
    %c0_i32_0 = arith.constant 0 : i32
    return %arg0, %c0_i32 : i32, i32
  }
  func.func @transform_3(%arg0: i32) -> (i32, i32) {
    %c0_i32 = arith.constant 0 : i32
    %c0_i32_0 = arith.constant 0 : i32
    %c0_i32_1 = arith.constant 0 : i32
    return %c0_i32, %c0_i32_0 : i32, i32
  }
  func.func @transform_4(%arg0: i32) -> (i32, i32) {
    %c0_i32 = arith.constant 0 : i32
    %c0_i32_0 = arith.constant 0 : i32
    %c0_i32_1 = arith.constant 0 : i32
    return %c0_i32, %c0_i32_0 : i32, i32
  }
  func.func @transform_5(%arg0: i32) -> (i32, i32) {
    %c0_i32 = arith.constant 0 : i32
    %c0_i32_0 = arith.constant 0 : i32
    return %arg0, %c0_i32 : i32, i32
  }
}

</mosaic_0001>

<bundles_post_ra>
// kernel: _lti_forward_batched.1
= control target key start
LH: loop header
LB: loop body
LE: loop exit
PB: predicated region body
PF: predicated region fallthrough
CT: control target
= control target key end

     0   :  { %10 = vsyncpa [#allocation3], 0  ;;  %s460_s0 = inlined_call_operand.hbm [shape: f32[4,32], index: 0, kind: input, shape index: {}]   ;;  %s461_s1 = inlined_call_operand.hbm [shape: f32[4,8], index: 1, kind: input, shape index: {}]   ;;  %s462_s2 = inlined_call_operand.vmem [shape: f32[4,32], index: 2, kind: input, shape index: {}]   ;;  %s463_s3 = inlined_call_operand.hbm [shape: f32[32,32], index: 3, kind: input, shape index: {}]   ;;  %s464_s4 = inlined_call_operand.vmem [shape: f32[8,32], index: 4, kind: input, shape index: {}]   ;;  %s465_s5 = inlined_call_operand.hbm [shape: f32[4,32], index: 5, kind: output, shape index: {}]  }
   0x1   :  { %11 = vsyncpa [#allocation6], 0 }
   0x2   :  { %12 = vsyncpa [#allocation4], 0  ;;  %s367_s18 = smov [#allocation5]   ;;  %s368_s20 = smov [#allocation2]  }
   0x3   :  { %s29_s19 = sshll.u32 %s367_s18, 4  ;;  %s19_s21 = sshll.u32 %s368_s20, 4  ;;  %s30_s19 = int_to_ptr.vmem [resolvable:$true] %s29_s19  ;;  %s20_s21 = int_to_ptr.vmem [resolvable:$true] %s19_s21 }
   0x4   :  { %s273_s24 = scalar_lea.hbm %s461_s1, 64 }
   0x5   :  { %p274_p0 = scmp.ne.s32.totalorder %s461_s1, %s273_s24  ;;  %p277_p1 = scmp.lt.u32.totalorder %s273_s24, %s461_s1 }
   0x7   :  { %p279_p2 = pnand %p277_p1, %p274_p0 }
   0x9   :  { %282 = shalt.err (!%p279_p2)
}
   0xa   :  { %s283_s29 = scalar_lea.vmem %s30_s19, 64  ;;  %p288_p4 = scmp.lt.s32.totalorder %s30_s19, %s30_s19 }
   0xb   :  { %p284_p3 = scmp.ne.s32.totalorder %s30_s19, %s283_s29  ;;  %p289_p5 = scmp.lt.s32.totalorder %s283_s29, %s283_s29 }
   0xd   :  { %p290_p6 = por %p289_p5, %p288_p4 }
   0xf   :  { %p291_p7 = pnand %p290_p6, %p284_p3 }
  0x11   :  { %294 = shalt.err (!%p291_p7)
}
  0x12   :  { %32 = dma.hbm_to_vmem [thread:$0]  %s461_s1, 64, %s30_s19, [#allocation6]  }
  0x13   :  { %s295_s9 = scalar_lea.hbm %s460_s0, 64 }
  0x14   :  { %p296_p8 = scmp.ne.s32.totalorder %s460_s0, %s295_s9  ;;  %p299_p9 = scmp.lt.u32.totalorder %s295_s9, %s460_s0 }
  0x16   :  { %p301_p10 = pnand %p299_p9, %p296_p8 }
  0x18   :  { %304 = shalt.err (!%p301_p10)
}
  0x19   :  { %s305_s14 = scalar_lea.vmem %s20_s21, 64  ;;  %p310_p12 = scmp.lt.s32.totalorder %s20_s21, %s20_s21 }
  0x1a   :  { %p306_p11 = scmp.ne.s32.totalorder %s20_s21, %s305_s14  ;;  %p311_p13 = scmp.lt.s32.totalorder %s305_s14, %s305_s14 }
  0x1c   :  { %p312_p0 = por %p311_p13, %p310_p12 }
  0x1e   :  { %p313_p1 = pnand %p312_p0, %p306_p11 }
  0x20   :  { %316 = shalt.err (!%p313_p1)
}
  0x21   :  { %22 = dma.hbm_to_vmem [thread:$0]  %s460_s0, 64, %s20_s21, [#allocation3]  }
  0x22   :  { %s369_s16 = smov [#allocation7]   ;;  %s317_s20 = scalar_lea.hbm %s463_s3, 512 }
  0x23   :  { %s40_s17 = sshll.u32 %s369_s16, 4  ;;  %p318_p2 = scmp.ne.s32.totalorder %s463_s3, %s317_s20  ;;  %s41_s17 = int_to_ptr.vmem [resolvable:$true] %s40_s17 }
  0x24   :  { %p321_p3 = scmp.lt.u32.totalorder %s317_s20, %s463_s3 }
  0x26   :  { %p323_p4 = pnand %p321_p3, %p318_p2 }
  0x28   :  { %326 = shalt.err (!%p323_p4)
}
  0x29   :  { %s327_s26 = scalar_lea.vmem %s41_s17, 512  ;;  %p332_p6 = scmp.lt.s32.totalorder %s41_s17, %s41_s17 }
  0x2a   :  { %p328_p5 = scmp.ne.s32.totalorder %s41_s17, %s327_s26  ;;  %p333_p7 = scmp.lt.s32.totalorder %s327_s26, %s327_s26 }
  0x2c   :  { %p334_p8 = por %p333_p7, %p332_p6 }
  0x2e   :  { %p335_p9 = pnand %p334_p8, %p328_p5 }
  0x30   :  { %338 = shalt.err (!%p335_p9)
}
  0x31   :  { %s370_s0 = smov 128   ;;  %s371_s21 = smov 8  }
  0x32   :  { %46 = dma.hbm_to_vmem [thread:$0]  %s463_s3, 512, %s41_s17, [#allocation6], %s370_s0, %s370_s0, %s371_s21  }
  0x33   :  { %361 = dma.done.wait [#allocation3], 64  }
  0x34   :  { %362 = vsyncadd [#allocation3], 4294967232 }
  0x35   :  { %363 = dma.done.wait [#allocation6], 576  }
  0x36   :  { %364 = vsyncadd [#allocation6], 4294966720  ;;  %v372_v0 = vmov 0.0|0.0   ;;  %v373_v1 = vmov 0.0   ;;  %vm374_vm0 = vmmov 0   ;;  %v59_v2 = vld [vmem:[#allocation7] sm:$0xff] }
  0x37   :  { %258 = vmatprep.subr.bf16.mxu1 %v372_v0  ;;  %242 = vmatprep.subr.mxu0 %v373_v1  ;;  %v60_v3 = vld [vmem:[#allocation7 + $0x8] sm:$0xff]  ;;  %v61_v4 = vld [vmem:[#allocation7 + $0x10] sm:$0xff]  ;;  %vm65_vm1 = vcmask 64512   ;;  %v62_v6 = vld [vmem:[#allocation7 + $0x18] sm:$0xff]  ;;  %vm139_vm2 = vcmask 261120   ;;  %s375_s7 = smov [#allocation8]  }
  0x38   :  { %244 = vmatprep.mubr.msk.f32.mxu0 %vm374_vm0, %v373_v1  ;;  %255 = vmatprep.mubr.msk.f32.mxu1 %vm374_vm0, %v373_v1  ;;  %v259_v5 = vpack.c.bf16 %v60_v3, %v59_v2  ;;  %v64_v7 = vld [vmem:[%s464_s4] sm:$0xff]  ;;  %v63_v8 = vld [vmem:[#allocation5] sm:$0xf]  ;;  %v262_v9 = vpack.c.bf16 %v62_v6, %v61_v4  ;;  %v58_v10 = vld [vmem:[#allocation2] sm:$0xf]  ;;  %s223_s8 = sshll.u32 %s375_s7, 4  ;;  %s224_s8 = int_to_ptr.vmem [resolvable:$true] %s223_s8 }
  0x39   :  { %243 = vmatpush3.msra.mxu0 %v64_v7  ;;  %v213_v14 = vld [vmem:[%s462_s2] sm:$0xf]  ;;  %vm215_vm3 = vcmask 257024   ;;  %s339_s4 = scalar_lea.vmem %s224_s8, 64  ;;  %p344_p11 = scmp.lt.s32.totalorder %s224_s8, %s224_s8 }
  0x3a   :  { %260 = vmatpush3.bf16.msra.mxu1 %v259_v5  ;;  %245 = vmatmul.mubr.msk.f32.vlgmr.msra.gmra.mrb[0].mxu0 %vm65_vm1, %v63_v8  ;;  %p340_p10 = scmp.ne.s32.totalorder %s224_s8, %s339_s4  ;;  %p345_p12 = scmp.lt.s32.totalorder %s339_s4, %s339_s4 }
  0x3b   :  { %261 = vmatprep.subr.bf16.mxu1 %v372_v0 }
  0x3c   :  { %p346_p13 = por %p345_p12, %p344_p11 }
  0x3e   :  { %263 = vmatpush3.bf16.msra.mxu1 %v262_v9  ;;  %p347_p0 = pnand %p346_p13, %p340_p10 }
  0x41   :  { %256 = vmatmul.mubr.msk.f32.vlgmr.msra.gmra.mrb[0].mxu1 %vm139_vm2, %v58_v10 }
 0x10d   :  { %v135_v11 = vpop.f32.mrb[0].mxu0 }
 0x10e   :  { %v246_v12 = vpop.f32.mrb[1].mxu0 }
 0x114   :  { %v209_v13 = vpop.f32.mrb[0].mxu1 }
 0x115   :  { %v210_v15 = vadd.f32 %v209_v13, %v135_v11  ;;  %v257_v16 = vpop.f32.mrb[1].mxu1 }
 0x117   :  { %v214_v17 = vadd.f32 %v213_v14, %v210_v15 }
 0x119   :  { %216 = vst.msk [vmem:[#allocation8] sm:$0xf] %vm215_vm3, %v214_v17 }
 0x11a   :  { %350 = shalt.err (!%p347_p0)
}
 0x11b   :  { %s351_s11 = scalar_lea.hbm %s465_s5, 64 }
 0x11c   :  { %p352_p1 = scmp.ne.s32.totalorder %s465_s5, %s351_s11  ;;  %p355_p2 = scmp.lt.u32.totalorder %s351_s11, %s465_s5 }
 0x11e   :  { %p357_p3 = pnand %p355_p2, %p352_p1 }
 0x120   :  { %360 = shalt.err (!%p357_p3)
}
 0x121   :  { %226 = dma.vmem_to_hbm [thread:$0]  %s224_s8, 64, %s465_s5, [#allocation4]  }
 0x122   :  { %365 = dma.done.wait [#allocation4], 64  }
 0x123   :  { %366 = vsyncadd [#allocation4], 4294967232 }
 0x124   :  { %230 = vsyncpa [#allocation3], 1 }
 0x125   :  { %231 = vsyncpa [#allocation6], 1 }
 0x126   :  { %232 = vsyncpa [#allocation4], 1 }

</bundles_post_ra>
